<compile_context>
chip_gen: v7x
topology: tpu7x:2x2x1
jax: 0.10.0
libtpu: 0.0.40
codegen_flags: <defaults>
</compile_context>

<pallas_src>
import functools

import jax
import jax.numpy as jnp
from jax.experimental import pallas as pl
from jax.experimental.pallas import tpu as pltpu


def _tv_partial_kernel(x_ref, dy_ref, dx_ref, *, use_roll):
    """Per-block partial sums of squared vertical/horizontal diffs.

    x_ref block: (TB, H, W) -- a batch of channel planes (no [0]-squeeze).
    """
    x = x_ref[...]

    if use_roll:
        # Shift-and-mask:  d[:, i, :] = x[:, i, :] - x[:, i-1, :]  (the wrapped
        # seam at i == 0 is garbage and zeroed by the mask).  The roll runs on
        # the otherwise-idle XLU slot, the seam mask is a single select, and
        # the f32 upcast fuses into the subtraction, so no boundary-crossing
        # block-sized VMEM copies are materialized.
        d_y = x.astype(jnp.float32) - pltpu.roll(x, shift=1, axis=1).astype(jnp.float32)
        d_x = x.astype(jnp.float32) - pltpu.roll(x, shift=1, axis=2).astype(jnp.float32)
        row = jax.lax.broadcasted_iota(jnp.int32, x.shape, 1)
        col = jax.lax.broadcasted_iota(jnp.int32, x.shape, 2)
        d_y = jnp.where(row > 0, d_y, 0.0)
        d_x = jnp.where(col > 0, d_x, 0.0)
    else:
        # Fallback for plane dims where the XLU roll lowering is not
        # guaranteed (W not a multiple of 128 / H not a multiple of 8).
        # Upcast is fused into each sliced operand (bf16 slices stay bf16).
        d_y = x[:, 1:, :].astype(jnp.float32) - x[:, :-1, :].astype(jnp.float32)
        d_x = x[:, :, 1:].astype(jnp.float32) - x[:, :, :-1].astype(jnp.float32)

    # TODO(synk): on v7x, route these accumulations through the idle MXU
    # (ones-vector contraction) to keep the VALU slot below saturation.
    dy_s = jnp.sum(d_y * d_y)
    dx_s = jnp.sum(d_x * d_x)

    # Per-block partial sums on a single 128-lane row (tiny, lane-aligned
    # writeback; distinct slab per grid block -> fully "parallel" axis).
    dy_ref[...] = jnp.full(dy_ref.shape, dy_s, dtype=jnp.float32)
    dx_ref[...] = jnp.full(dx_ref.shape, dx_s, dtype=jnp.float32)


def _vmem_capacity_bytes():
    """Physical VMEM per TensorCore (128 MiB v5e/v6e, 64 MiB v7x)."""
    try:
        cap = int(getattr(pltpu.get_tpu_info(), "vmem_capacity_bytes", 0))
        if cap > 0:
            return cap
    except Exception:
        pass
    return 64 * 1024 * 1024  # conservative default (v7x per-TC VMEM)


def _choose_tb(p, h, w, itemsize, vmem_cap):
    """How many (H, W) planes to process per grid step (generation-aware).

    Footprint per in-flight step ~= 2x double-buffered input block (input
    dtype) + ~3 block-sized f32 temporaries (diffs / squares).  We spend ~3/8
    of physical VMEM on that and request a vmem limit of 3/4 of physical, so
    the sizing is safe on 64 MiB (v7x) and uses the headroom on 128 MiB
    (v5e/v6e) parts.
    """
    h_pad = -(-h // 8) * 8          # sublane padding
    w_pad = -(-w // 128) * 128      # lane padding
    plane_in = h_pad * w_pad * itemsize
    plane_f32 = h_pad * w_pad * 4
    per_plane = 2 * plane_in + 3 * plane_f32
    budget = (vmem_cap * 3) // 8
    tb = max(1, budget // per_plane)
    if p >= 2:
        # Keep at least 2 grid blocks so the single "parallel" grid axis
        # shards across both TensorCores on v7x (no-op on 1-TC v5e/v6e).
        tb = min(tb, (p + 1) // 2)
    return int(min(tb, p))


def tv_loss(x):
    """Pallas equivalent of TVLoss.forward. x: (B, C, H, W)."""
    b, c, h, w = x.shape
    p = b * c
    x2 = x.reshape(p, h, w)

    vmem_cap = _vmem_capacity_bytes()
    tb = _choose_tb(p, h, w, x.dtype.itemsize, vmem_cap)
    nb = -(-p // tb)                  # ceil(p / tb)
    p_pad = nb * tb
    if p_pad != p:
        # Zero planes contribute 0 to both diff sums (diffs never cross the
        # padded P axis), so padding is harmless.
        x2 = jnp.pad(x2, ((0, p_pad - p), (0, 0), (0, 0)))

    # roll+mask path only when the plane dims are lane/sublane aligned.
    use_roll = (h % 8 == 0) and (w % 128 == 0)

    # TODO(synk): add an H-tiled grid axis with a 1-row halo for planes too
    # large to fit a single VMEM block (e.g. f32 4Kx4K on v7x).
    # TODO(synk): lane-pack k=128//W rows per 128-lane group (with seam masks)
    # for W << 128 inputs to recover lane/DMA utilization.

    kernel = functools.partial(_tv_partial_kernel, use_roll=use_roll)

    dy_parts, dx_parts = pl.pallas_call(
        kernel,
        out_shape=(
            jax.ShapeDtypeStruct((nb, 1, 128), jnp.float32),
            jax.ShapeDtypeStruct((nb, 1, 128), jnp.float32),
        ),
        grid_spec=pltpu.PrefetchScalarGridSpec(
            num_scalar_prefetch=0,
            grid=(nb,),
            in_specs=[
                pl.BlockSpec((tb, h, w), lambda i: (i, 0, 0)),
            ],
            out_specs=[
                pl.BlockSpec((1, 1, 128), lambda i: (i, 0, 0)),
                pl.BlockSpec((1, 1, 128), lambda i: (i, 0, 0)),
            ],
        ),
        compiler_params=pltpu.CompilerParams(
            dimension_semantics=("parallel",),        # per-block outputs -> safe
            vmem_limit_bytes=(vmem_cap * 3) // 4,     # generation-aware limit
        ),
    )(x2)

    dy_sum = jnp.sum(dy_parts[:, 0, 0])
    dx_sum = jnp.sum(dx_parts[:, 0, 0])

    # MSELoss reduction='mean' over each sliced tensor.
    dy_mean = dy_sum / jnp.float32(b * c * (h - 1) * w)
    dx_mean = dx_sum / jnp.float32(b * c * h * (w - 1))
    return 2.0 * (dy_mean + dx_mean)


def tv_loss_ref(x):
    """Pure-JAX reference matching the PyTorch forward."""
    x = x.astype(jnp.float32)
    dy = jnp.mean((x[:, :, 1:, :] - x[:, :, :-1, :]) ** 2)
    dx = jnp.mean((x[:, :, :, 1:] - x[:, :, :, :-1]) ** 2)
    return 2.0 * (dy + dx)


if __name__ == "__main__":
    key = jax.random.PRNGKey(0)
    x = jax.random.normal(key, (2, 4, 16, 16), dtype=jnp.float32)

    out = jax.block_until_ready(jax.jit(tv_loss)(x))
    ref = jax.block_until_ready(tv_loss_ref(x))

    assert jnp.allclose(out, ref, rtol=1e-5, atol=1e-5), (out, ref)
    print("KERNEL_OK")
</pallas_src>

<mosaic_0001>
module attributes {stable_mosaic.version = 11 : i64} {
  func.func @_tv_partial_kernel(%arg0: i32, %arg1: memref<4x16x16xf32, #tpu.memory_space<vmem>>, %arg2: memref<1x1x128xf32, #tpu.memory_space<vmem>>, %arg3: memref<1x1x128xf32, #tpu.memory_space<vmem>>) attributes {dimension_semantics = [#tpu.dimension_semantics<parallel>], iteration_bounds = array<i64: 2>, scalar_prefetch = 0 : i64, scratch_operands = 0 : i64, tpu.core_type = #tpu.core_type<tc>, window_params = [{transform_indices = @transform_0, window_bounds = array<i64: 4, 16, 16>}, {transform_indices = @transform_1, window_bounds = array<i64: 1, 1, 128>}, {transform_indices = @transform_2, window_bounds = array<i64: 1, 1, 128>}]} {
    %c0 = arith.constant 0 : index
    %c0_0 = arith.constant 0 : index
    %c0_1 = arith.constant 0 : index
    %0 = vector.load %arg1[%c0, %c0_0, %c0_1] : memref<4x16x16xf32, #tpu.memory_space<vmem>>, vector<4x16x16xf32>
    %1 = vector.extract_strided_slice %0 {offsets = [0, 1, 0], sizes = [4, 15, 16], strides = [1, 1, 1]} : vector<4x16x16xf32> to vector<4x15x16xf32>
    %2 = vector.extract_strided_slice %0 {offsets = [0, 0, 0], sizes = [4, 15, 16], strides = [1, 1, 1]} : vector<4x16x16xf32> to vector<4x15x16xf32>
    %3 = arith.subf %1, %2 : vector<4x15x16xf32>
    %4 = vector.extract_strided_slice %0 {offsets = [0, 0, 1], sizes = [4, 16, 15], strides = [1, 1, 1]} : vector<4x16x16xf32> to vector<4x16x15xf32>
    %5 = vector.extract_strided_slice %0 {offsets = [0, 0, 0], sizes = [4, 16, 15], strides = [1, 1, 1]} : vector<4x16x16xf32> to vector<4x16x15xf32>
    %6 = arith.subf %4, %5 : vector<4x16x15xf32>
    %7 = arith.mulf %3, %3 : vector<4x15x16xf32>
    %8 = vector.shape_cast %7 : vector<4x15x16xf32> to vector<1x4x15x16xf32>
    %cst = arith.constant dense<0.000000e+00> : vector<1xf32>
    %9 = vector.multi_reduction <add>, %8, %cst [1, 2, 3] : vector<1x4x15x16xf32> to vector<1xf32>
    %10 = vector.shape_cast %9 : vector<1xf32> to vector<1x1x1x1xf32>
    %11 = vector.extract %10[0, 0, 0, 0] : f32 from vector<1x1x1x1xf32>
    %12 = arith.mulf %6, %6 : vector<4x16x15xf32>
    %13 = vector.shape_cast %12 : vector<4x16x15xf32> to vector<1x4x16x15xf32>
    %cst_2 = arith.constant dense<0.000000e+00> : vector<1xf32>
    %14 = vector.multi_reduction <add>, %13, %cst_2 [1, 2, 3] : vector<1x4x16x15xf32> to vector<1xf32>
    %15 = vector.shape_cast %14 : vector<1xf32> to vector<1x1x1x1xf32>
    %16 = vector.extract %15[0, 0, 0, 0] : f32 from vector<1x1x1x1xf32>
    %17 = vector.broadcast %11 : f32 to vector<1x1x128xf32>
    %c0_3 = arith.constant 0 : index
    %c0_4 = arith.constant 0 : index
    %c0_5 = arith.constant 0 : index
    %18 = vector.load %arg2[%c0_3, %c0_4, %c0_5] : memref<1x1x128xf32, #tpu.memory_space<vmem>>, vector<1x1x128xf32>
    tpu.vector_store %arg2[%c0_3, %c0_4, %c0_5], %17 {strides = array<i32>} : memref<1x1x128xf32, #tpu.memory_space<vmem>>, vector<1x1x128xf32>,
    %19 = vector.broadcast %16 : f32 to vector<1x1x128xf32>
    %c0_6 = arith.constant 0 : index
    %c0_7 = arith.constant 0 : index
    %c0_8 = arith.constant 0 : index
    %20 = vector.load %arg3[%c0_6, %c0_7, %c0_8] : memref<1x1x128xf32, #tpu.memory_space<vmem>>, vector<1x1x128xf32>
    tpu.vector_store %arg3[%c0_6, %c0_7, %c0_8], %19 {strides = array<i32>} : memref<1x1x128xf32, #tpu.memory_space<vmem>>, vector<1x1x128xf32>,
    return
  }
  func.func @transform_0(%arg0: i32) -> (i32, i32, i32) {
    %c0_i32 = arith.constant 0 : i32
    %c0_i32_0 = arith.constant 0 : i32
    %c0_i32_1 = arith.constant 0 : i32
    return %arg0, %c0_i32, %c0_i32_0 : i32, i32, i32
  }
  func.func @transform_1(%arg0: i32) -> (i32, i32, i32) {
    %c0_i32 = arith.constant 0 : i32
    %c0_i32_0 = arith.constant 0 : i32
    %c0_i32_1 = arith.constant 0 : i32
    return %arg0, %c0_i32, %c0_i32_0 : i32, i32, i32
  }
  func.func @transform_2(%arg0: i32) -> (i32, i32, i32) {
    %c0_i32 = arith.constant 0 : i32
    %c0_i32_0 = arith.constant 0 : i32
    %c0_i32_1 = arith.constant 0 : i32
    return %arg0, %c0_i32, %c0_i32_0 : i32, i32, i32
  }
}

</mosaic_0001>

<bundles_post_ra>
// kernel: tv_loss.1
= control target key start
LH: loop header
LB: loop body
LE: loop exit
PB: predicated region body
PF: predicated region fallthrough
CT: control target
= control target key end

     0   :  { %8 = vsyncpa [#allocation3], 0  ;;  %s765_s0 = inlined_call_operand.hbm [shape: f32[8,16,16], index: 0, kind: input, shape index: {}]   ;;  %s766_s1 = inlined_call_operand.vmem [shape: f32[2,1,128], index: 1, kind: output, shape index: {0}]   ;;  %s767_s2 = inlined_call_operand.vmem [shape: f32[2,1,128], index: 2, kind: output, shape index: {1}]  }
   0x1   :  { %10 = vsyncpa [#allocation3 + $0x1], 0  ;;  %s610_s9 = smov 0   ;;  %s612_s10 = smov 0  }
   0x2   :  { %s614_s11 = smov 0   ;;  %s616_s12 = smov 0  }
   0x3 LB: > { %s629_s13 = sadd.s32 4294967295, %s588_s12   ;;  %s632_s14 = sadd.s32 1, %s588_s12   ;;  %s588_s12 = sphi %s616_s12, %s774_s12   ;;  %s584_s11 = sphi %s614_s11, %s773_s11   ;;  %s580_s10 = sphi %s612_s10, %s772_s10   ;;  %s576_s9 = sphi %s610_s9, %s771_s9  }
   0x4   : > { %s20_s15 = ssub.s32 %s588_s12, %s632_s14  ;;  %s23_s16 = sadd.s32 1, %s584_s11 }
   0x5   : > { %p21_p0 = scmp.eq.s32.totalorder %s20_s15, 0  ;;  %p30_p1 = scmp.ne.s32.totalorder %s584_s11, %s580_s10 }
   0x6   : > { %p31_p2 = scmp.eq.s32.totalorder %s588_s12, 0  ;;  %p36_p3 = scmp.ne.s32.totalorder %s580_s10, %s576_s9 }
   0x7   : > { %s642_s17 = scalar_select %p21_p0, %s584_s11, %s23_s16  }
   0x8   : > { %p32_p4 = por %p31_p2, %p30_p1  ;;  %p37_p5 = scmp.eq.s32.totalorder %s629_s13, 0 }
   0x9   : > { %p487_p6 = scmp.lt.s32.totalorder %s588_s12, 2  ;;  %s112_s19 = sand.u32 1, %s584_s11  }
   0xa   : > { %p646_p7 = por %p37_p5, %p36_p3  ;;  %s467_s20 = sshll.u32 %s112_s19, 6 }
   0xb   : > { %s476_s21 = sshll.u32 %s588_s12, 10  ;;  %s116_s25 = scalar_lea.vmem [#allocation2], %s467_s20 }
   0xc   : > { %s655_s24 = scalar_lea.hbm %s765_s0, %s476_s21  ;;  %s124_s26 = sshll.u32 %s116_s25, 4  ;;  %s657_s26 = int_to_ptr.vmem [resolvable:$true] %s124_s26 }
   0xd   : > { %p659_p8 = pnand %p487_p6, %p32_p4  ;;  %s664_s28 = scalar_lea.sflag [#allocation3], %s112_s19 }
   0xe   : > { %s524_s29 = scalar_lea.hbm %s655_s24, 1024  ;;  %s529_s4 = scalar_lea.hbm %s765_s0, 2048 }
   0xf   : > { %p525_p10 = scmp.ne.s32.totalorder %s655_s24, %s524_s29  ;;  %p526_p11 = pneg %p659_p8 }
  0x10   : > { %p530_p0 = scmp.lt.u32.totalorder %s655_s24, %s765_s0  ;;  %p531_p1 = scmp.lt.u32.totalorder %s529_s4, %s524_s29 }
  0x11   : > { %p527_p12 = pnand %p526_p11, %p525_p10  ;;  %p533_p3 = scmp.lt.u32.totalorder %s524_s29, %s655_s24 }
  0x12   : > { %p532_p2 = por %p531_p1, %p530_p0 }
  0x13   : > { %p528_p13 = pneg %p527_p12 }
  0x14   : > { %p534_p4 = por %p533_p3, %p532_p2 }
  0x16   : > { %p535_p5 = pnand %p534_p4, %p528_p13 }
  0x18   : > { %538 = shalt.err (!%p535_p5)
}
  0x19   : > { %s539_s7 = scalar_lea.vmem %s657_s26, 1024  ;;  %s590_s8 = smov [#allocation2]  }
  0x1a   : > { %p540_p6 = scmp.ne.s32.totalorder %s657_s26, %s539_s7  ;;  %s544_s9 = sshll.u32 %s590_s8, 4  ;;  %s545_s9 = int_to_ptr.vmem [resolvable:$false] %s544_s9 }
  0x1b   : > { %s546_s15 = scalar_lea.vmem %s545_s9, 2048  ;;  %p547_p9 = scmp.lt.s32.totalorder %s657_s26, %s545_s9 }
  0x1c   : > { %p542_p10 = pnand %p540_p6, %p526_p11  ;;  %p548_p0 = scmp.lt.s32.totalorder %s546_s15, %s539_s7 }
  0x1e   : > { %p543_p12 = pneg %p542_p10  ;;  %p549_p1 = por %p548_p0, %p547_p9 }
  0x20   : > { %p550_p2 = pnand %p549_p1, %p543_p12 }
  0x22   : > { %553 = shalt.err (!%p550_p2)
}
  0x23   : > { %s591_s16 = smov 128   ;;  %s592_s19 = smov 8  }
  0x24   : > { %486 = dma.hbm_to_vmem [thread:$0]  (!%p659_p8), %s655_s24, 1024, %s657_s26, %s664_s28, %s591_s16, %s591_s16, %s592_s19  }
  0x25   : > { %p132_p11 = scmp.lt.s32.totalorder %s588_s12, 3  ;;  %p770_p13 = scmp.ge.s32.totalorder %s588_s12, 1 }
  0x27   : > { %p133_p3 = pnand %p770_p13, %p132_p11 }
  0x28   : > { %s138_s20 = sand.u32 (!%p133_p3), 1, %s580_s10  }
  0x29   : > { %136 = sbr.rel (%p133_p3) target bundleno = 509 (0x1fd), region = 24  ;;  %s472_s21 = sshll.u32 (!%p133_p3), %s138_s20, 6 }
  0x2a   : > { %s139_s22 = scalar_lea.sflag (!%p133_p3), [#allocation3], %s138_s20  ;;  %s142_s23 = scalar_lea.vmem (!%p133_p3), [#allocation2], %s472_s21 }
  0x30   : > { %571 = dma.done.wait (%p646_p7), %s139_s22, 1024  }
  0x31   : > { %573 = vsyncadd (%p646_p7), %s139_s22, 4294966272  ;;  %v171_v0 = vld [vmem:[%s142_s23] sm:$0xff]  ;;  %v173_v1 = vld [vmem:[%s142_s23 + $0x10] sm:$0xff]  ;;  %s593_s25 = smov 1   ;;  %vm187_vm0 = vcmask 1040384   ;;  %s594_s12 = smov 127  }
  0x32   : > { %216 = vrot.lane.b32.xlu0 %v171_v0, %s593_s25  ;;  %220 = vrot.lane.b32.xlu1 %v173_v1, %s593_s25  ;;  %v172_v2 = vld [vmem:[%s142_s23 + $0x8] sm:$0xff]  ;;  %v174_v3 = vld [vmem:[%s142_s23 + $0x18] sm:$0xff]  ;;  %v188_v8 = vrot.slane %v171_v0, 7  ;;  %v191_v10 = vrot.slane %v173_v1, 7  ;;  %vm264_vm1 = vcmask 1046528   ;;  %vm285_vm2 = vcmask 130048  }
  0x33   : > { %v175_v4 = vld [vmem:[%s142_s23 + $0x20] sm:$0xff]  ;;  %v176_v5 = vld [vmem:[%s142_s23 + $0x28] sm:$0xff]  ;;  %v700_v6 = vld [vmem:[%s142_s23 + $0x30] sm:$0xff]  ;;  %v189_v9 = vrot.slane %v172_v2, 7  ;;  %v192_v12 = vrot.slane %v174_v3, 7  ;;  %vm287_vm3 = vcmask 129024  }
  0x34   : > { %v702_v7 = vld [vmem:[%s142_s23 + $0x38] sm:$0xff]  ;;  %v208_v17 = vsub.f32 %v171_v0, %v188_v8  ;;  %v210_v21 = vsub.f32 %v173_v1, %v191_v10  ;;  %v194_v22 = vrot.slane %v175_v4, 7  ;;  %v195_v23 = vrot.slane %v176_v5, 7  ;;  %p165_p7 = scmp.lt.s32.totalorder %s629_s13, 1 }
  0x35   : > { %v190_v11 = vsel %vm187_vm0, %v188_v8, %v189_v9  ;;  %v193_v19 = vsel %vm187_vm0, %v191_v10, %v192_v12  ;;  %v197_v54 = vrot.slane %v700_v6, 7  ;;  %v198_v55 = vrot.slane %v702_v7, 7 }
  0x36   : > { %218 = vrot.lane.b32.xlu0 %v172_v2, %s593_s25  ;;  %222 = vrot.lane.b32.xlu1 %v174_v3, %s593_s25  ;;  %v209_v18 = vsub.f32 %v172_v2, %v190_v11  ;;  %v248_v29 = vmul.f32 %v208_v17, %v208_v17  ;;  %v211_v31 = vsub.f32 %v174_v3, %v193_v19  ;;  %vm351_vm4 = vcmask 121856   ;;  %s776_s13 = smov (!%p165_p7, %s629_s13), 1 }
  0x37   : > { %v250_v33 = vmul.f32 %v210_v21, %v210_v21  ;;  %v196_v34 = vsel %vm187_vm0, %v194_v22, %v195_v23  ;;  %v212_v44 = vsub.f32 %v175_v4, %v194_v22  ;;  %v199_v63 = vsel %vm187_vm0, %v197_v54, %v198_v55  ;;  %s167_s26 = scalar_lea.vmem %s766_s1, %s776_s13  ;;  %s170_s30 = scalar_lea.vmem %s767_s2, %s776_s13 }
  0x38   : > { %v249_v30 = vmul.f32 %v209_v18, %v209_v18  ;;  %v265_v40 = vrot.slane %v248_v29, 1  ;;  %v251_v42 = vmul.f32 %v211_v31, %v211_v31  ;;  %v213_v45 = vsub.f32 %v176_v5, %v196_v34 }
  0x39   : > { %v268_v48 = vrot.slane %v250_v33, 1  ;;  %v252_v60 = vmul.f32 %v212_v44, %v212_v44 }
  0x3a   : > { %224 = vrot.lane.b32.xlu0 %v175_v4, %s593_s25  ;;  %226 = vrot.lane.b32.xlu1 %v176_v5, %s593_s25  ;;  %v266_v41 = vrot.slane %v249_v30, 1  ;;  %v269_v52 = vrot.slane %v251_v42, 1  ;;  %v253_v61 = vmul.f32 %v213_v45, %v213_v45 }
  0x3c   : > { %v267_v53 = vsel %vm264_vm1, %v265_v40, %v266_v41  ;;  %v288_v59 = vsel %vm287_vm3, %v266_v41, 0.0  ;;  %v270_v62 = vsel %vm264_vm1, %v268_v48, %v269_v52  ;;  %v292_v9 = vsel %vm287_vm3, %v269_v52, 0.0 }
  0x3d   : > { %v286_v58 = vsel %vm285_vm2, %v267_v53, 0.0 }
  0x3e   : > { %228 = vrot.lane.b32.xlu0 %v700_v6, %s593_s25  ;;  %230 = vrot.lane.b32.xlu1 %v702_v7, %s593_s25 }
  0xa4   : > { %v217_v13 = vpop.permute.xlu0 %216  ;;  %v221_v14 = vpop.permute.xlu1 %220 }
  0xa5   : > { %v240_v15 = vsub.f32 %v171_v0, %v217_v13  ;;  %v242_v16 = vsub.f32 %v173_v1, %v221_v14  ;;  %v289_v0 = vadd.f32 %v288_v59, %v286_v58  ;;  %v290_v1 = vsel %vm285_vm2, %v270_v62, 0.0 }
  0xa7   : > { %v311_v20 = vmul.f32 %v240_v15, %v240_v15  ;;  %v313_v26 = vmul.f32 %v242_v16, %v242_v16  ;;  %v291_v8 = vadd.f32 %v290_v1, %v289_v0 }
  0xa8   : > { %v219_v24 = vpop.permute.xlu0 %218  ;;  %v223_v25 = vpop.permute.xlu1 %222 }
  0xa9   : > { %v241_v27 = vsub.f32 %v172_v2, %v219_v24  ;;  %327 = vrot.lane.b32.xlu0 %v311_v20, %s594_s12  ;;  %v243_v28 = vsub.f32 %v174_v3, %v223_v25  ;;  %v271_v2 = vrot.slane %v252_v60, 1  ;;  %v214_v3 = vsub.f32 %v700_v6, %v197_v54 }
  0xaa   : > { %v293_v13 = vadd.f32 %v292_v9, %v291_v8 }
  0xab   : > { %v312_v32 = vmul.f32 %v241_v27, %v241_v27  ;;  %v314_v37 = vmul.f32 %v243_v28, %v243_v28  ;;  %v254_v10 = vmul.f32 %v214_v3, %v214_v3 }
  0xac   : > { %v225_v35 = vpop.permute.xlu0 %224  ;;  %v227_v36 = vpop.permute.xlu1 %226 }
  0xad   : > { %331 = vrot.lane.b32.xlu0 %v313_v26, %s594_s12  ;;  %329 = vrot.lane.b32.xlu1 %v312_v32, %s594_s12  ;;  %v244_v38 = vsub.f32 %v175_v4, %v225_v35  ;;  %v245_v39 = vsub.f32 %v176_v5, %v227_v36  ;;  %v215_v4 = vsub.f32 %v702_v7, %v199_v63  ;;  %v272_v5 = vrot.slane %v253_v61, 1 }
  0xae   : > { %v274_v15 = vrot.slane %v254_v10, 1 }
  0xaf   : > { %v315_v43 = vmul.f32 %v244_v38, %v244_v38  ;;  %v316_v49 = vmul.f32 %v245_v39, %v245_v39  ;;  %v255_v11 = vmul.f32 %v215_v4, %v215_v4  ;;  %v273_v12 = vsel %vm264_vm1, %v271_v2, %v272_v5 }
  0xb0   : > { %v229_v46 = vpop.permute.xlu0 %228  ;;  %v231_v47 = vpop.permute.xlu1 %230  ;;  %v294_v14 = vsel %vm285_vm2, %v273_v12, 0.0  ;;  %v296_v18 = vsel %vm287_vm3, %v272_v5, 0.0 }
  0xb1   : > { %333 = vrot.lane.b32.xlu1 %v314_v37, %s594_s12  ;;  %v246_v50 = vsub.f32 %v700_v6, %v229_v46  ;;  %335 = vrot.lane.b32.xlu0 %v315_v43, %s594_s12  ;;  %v247_v51 = vsub.f32 %v702_v7, %v231_v47  ;;  %v275_v16 = vrot.slane %v255_v11, 1  ;;  %v295_v17 = vadd.f32 %v294_v14, %v293_v13 }
  0xb3   : > { %v317_v56 = vmul.f32 %v246_v50, %v246_v50  ;;  %v318_v57 = vmul.f32 %v247_v51, %v247_v51  ;;  %v276_v6 = vsel %vm264_vm1, %v274_v15, %v275_v16  ;;  %v297_v19 = vadd.f32 %v296_v18, %v295_v17 }
  0xb4   : > { %v298_v7 = vsel %vm285_vm2, %v276_v6, 0.0  ;;  %v300_v21 = vsel %vm287_vm3, %v275_v16, 0.0 }
  0xb5   : > { %337 = vrot.lane.b32.xlu1 %v316_v49, %s594_s12  ;;  %339 = vrot.lane.b32.xlu0 %v317_v56, %s594_s12  ;;  %v299_v20 = vadd.f32 %v298_v7, %v297_v19 }
  0xb7   : > { %v301_v22 = vadd.f32 %v300_v21, %v299_v20 }
  0xb9   : > { %341 = vrot.lane.b32.xlu1 %v318_v57, %s594_s12 }
  0xd4   : > { %302 = vadd.xlane.f32.xlu0 %v301_v22 }
 0x11b   : > { %v328_v23 = vpop.permute.xlu0 %327 }
 0x11c   : > { %v352_v26 = vsel %vm351_vm4, %v328_v23, 0.0 }
 0x11f   : > { %v330_v24 = vpop.permute.xlu1 %329  ;;  %v332_v25 = vpop.permute.xlu0 %331 }
 0x120   : > { %v353_v27 = vsel %vm351_vm4, %v330_v24, 0.0  ;;  %v355_v29 = vsel %vm351_vm4, %v332_v25, 0.0 }
 0x121   : > { %v354_v28 = vadd.f32 %v353_v27, %v352_v26 }
 0x123   : > { %v356_v30 = vadd.f32 %v355_v29, %v354_v28  ;;  %v334_v31 = vpop.permute.xlu1 %333  ;;  %v336_v32 = vpop.permute.xlu0 %335 }
 0x124   : > { %v357_v33 = vsel %vm351_vm4, %v334_v31, 0.0  ;;  %v359_v34 = vsel %vm351_vm4, %v336_v32, 0.0 }
 0x125   : > { %v358_v35 = vadd.f32 %v357_v33, %v356_v30 }
 0x127   : > { %v360_v36 = vadd.f32 %v359_v34, %v358_v35  ;;  %v338_v37 = vpop.permute.xlu1 %337  ;;  %v340_v38 = vpop.permute.xlu0 %339 }
 0x128   : > { %v361_v39 = vsel %vm351_vm4, %v338_v37, 0.0  ;;  %v363_v40 = vsel %vm351_vm4, %v340_v38, 0.0 }
 0x129   : > { %v362_v41 = vadd.f32 %v361_v39, %v360_v36 }
 0x12b   : > { %v364_v42 = vadd.f32 %v363_v40, %v362_v41  ;;  %v342_v43 = vpop.permute.xlu1 %341 }
 0x12c   : > { %v365_v44 = vsel %vm351_vm4, %v342_v43, 0.0 }
 0x12d   : > { %v366_v45 = vadd.f32 %v365_v44, %v364_v42 }
 0x12f   : > { %367 = vadd.xlane.f32.xlu1 %v366_v45 }
 0x161   : > { %v303_v46 = vpop.xlane.xlu0 %302 }
 0x162   : > { %v304_v47 = vrot.slane %v303_v46, 4 }
 0x164   : > { %v305_v48 = vadd.f32 %v304_v47, %v303_v46 }
 0x166   : > { %v306_v49 = vrot.slane %v305_v48, 2 }
 0x168   : > { %v307_v50 = vadd.f32 %v306_v49, %v305_v48 }
 0x16a   : > { %v308_v51 = vrot.slane %v307_v50, 1 }
 0x16c   : > { %v309_v52 = vadd.f32 %v308_v51, %v307_v50 }
 0x16e   : > { %477 = vpush %v309_v52 }
 0x19f   : > { %s478_s27 = spop %477 }
 0x1a0   : > { %v376_v53 = vstv %s478_s27 }
 0x1a1   : > { %377 = vst [vmem:[%s167_s26] sm:$0x1] %v376_v53 }
 0x1bc   : > { %v368_v54 = vpop.xlane.xlu1 %367 }
 0x1bd   : > { %v369_v55 = vrot.slane %v368_v54, 4 }
 0x1bf   : > { %v370_v56 = vadd.f32 %v369_v55, %v368_v54 }
 0x1c1   : > { %v371_v57 = vrot.slane %v370_v56, 2 }
 0x1c3   : > { %v372_v58 = vadd.f32 %v371_v57, %v370_v56 }
 0x1c5   : > { %v373_v59 = vrot.slane %v372_v58, 1 }
 0x1c7   : > { %v374_v60 = vadd.f32 %v373_v59, %v372_v58 }
 0x1c9   : > { %479 = vpush %v374_v60 }
 0x1fa   : > { %s480_s3 = spop %479 }
 0x1fb   : > { %v378_v61 = vstv %s480_s3 }
 0x1fc   : > { %379 = vst [vmem:[%s170_s30] sm:$0x1] %v378_v61 }
 0x1fd PF: > { %p13_p8 = scmp.ge.s32.totalorder %s632_s14, 4   ;;  %s771_s9 = smov %s580_s10 }
 0x1fe   : > { %s772_s10 = smov %s584_s11  ;;  %s773_s11 = smov %s642_s17 }
 0x1ff   : > { %s774_s12 = smov %s632_s14  ;;  %15 = sbr.rel (!%p13_p8) target bundleno = 3 (0x3), region = 76 }
 0x206   :  { %409 = vsyncpa [#allocation3], 1 }
 0x207   :  { %411 = vsyncpa [#allocation3 + $0x1], 1 }

</bundles_post_ra>
